<compile_context>
chip_gen: v7x
topology: tpu7x:2x2x1
jax: 0.10.0
libtpu: 0.0.40
codegen_flags: <defaults>
</compile_context>

<pallas_src>
import math

import jax
import jax.numpy as jnp
from jax import lax
from jax.experimental import pallas as pl
from jax.experimental.pallas import tpu as pltpu

# ----------------------------- model dimensions ------------------------------
BATCH = 2
SEQ = 16
HIDDEN = 256
NUM_HEADS = 2
HEAD_DIM = HIDDEN // NUM_HEADS            # 128
KV_CHANNELS = HEAD_DIM
PROJ = KV_CHANNELS * NUM_HEADS            # projection_size == hidden_size
SEQ_LENGTH_CFG = 512                      # config.seq_length
NO_BIAS = True                            # config.no_bias -> c_proj has no bias

# bf16 weights / matmul operands (f32 accumulation).  Set to False for strict
# fp32 parity with the Torch module at the cost of 2x weight HBM bytes and
# multi-pass f32 MXU emulation on v6e/v7x.
USE_BF16_WEIGHTS = True
COMPUTE_DTYPE = jnp.bfloat16 if USE_BF16_WEIGHTS else jnp.float32
MASK_VALUE = float(jnp.finfo(jnp.float32).min)

# TODO(synk): flash-attn path, uint8 KV-cache-quantization CUDA kernels,
# attention dropout (eval -> p=0), layer_past concat / use_cache KV output,
# attention_mask / head_mask, logn-attn scaling (S <= config.seq_length), and
# partial rotary (rot_dim < head_dim) are not translated; this config selects
# the plain SDPA path implemented here.


# ------------------------------ fused Pallas kernel ---------------------------
def _fused_attn_kernel(x_ref, wqkv_ref, bqkv_ref, cos_ref, sin_ref, mask_ref,
                       wproj_ref, o_ref):
    """Whole forward (all batches, all heads) in one grid step.

    x_ref:     (B*S, H)              flattened hidden states
    wqkv_ref:  (H, 3*PROJ)           c_attn weight, pre-transposed (K, N), bf16
    bqkv_ref:  (1, 3*PROJ)           c_attn bias, f32
    cos_ref:   (B*NH*S, HEAD_DIM)    rotary cos, tiled for the stacked layout
    sin_ref:   (B*NH*S, HEAD_DIM)    rotary sin (rotate-half sign pre-folded)
    mask_ref:  (B*NH*S, B*NH*S)      additive block-diagonal causal mask
    wproj_ref: (PROJ, H)             c_proj weight, pre-transposed (K, N), bf16
    o_ref:     (B*S, H)
    """
    bs = x_ref.shape[0]                                     # B*S (static)

    # c_attn: (B*S, H) @ (H, 3*PROJ) + bias -> (B*S, 3*PROJ), f32 accumulate.
    x = x_ref[...].astype(COMPUTE_DTYPE)
    mixed = jnp.dot(x, wqkv_ref[...],
                    preferred_element_type=jnp.float32) + bqkv_ref[...]

    # Stack the per-head 128-wide lane-aligned slices along sublanes:
    # rows of the stacked tensors are ordered (head, batch, seq).
    def stack_heads(base):
        return jnp.concatenate(
            [mixed[:, base + h * HEAD_DIM: base + (h + 1) * HEAD_DIM]
             for h in range(NUM_HEADS)], axis=0)            # (NH*B*S, 128)

    q = stack_heads(0)
    k = stack_heads(PROJ)
    v = stack_heads(2 * PROJ)

    # Rotary: rotate_half(x) == sign * roll(x, hd/2); sign folded into sin.
    cos = cos_ref[...]
    sin_s = sin_ref[...]
    q = q * cos + pltpu.roll(q, HEAD_DIM // 2, 1) * sin_s
    k = k * cos + pltpu.roll(k, HEAD_DIM // 2, 1) * sin_s

    # One block-diagonal causal SDPA for all (batch, head) groups.
    scale = 1.0 / math.sqrt(HEAD_DIM)
    s = lax.dot_general(q.astype(COMPUTE_DTYPE), k.astype(COMPUTE_DTYPE),
                        (((1,), (1,)), ((), ())),
                        preferred_element_type=jnp.float32)  # (G*S, G*S)
    s = s * scale + mask_ref[...]
    # NOTE: safe only because the causal diagonal is always unmasked (true
    # here); a fully-masked row (attention_mask support) would need guarding.
    s = s - jnp.max(s, axis=-1, keepdims=True)
    p = jnp.exp(s)
    p = p / jnp.sum(p, axis=-1, keepdims=True)               # exact reciprocal

    ctx = jnp.dot(p.astype(COMPUTE_DTYPE), v.astype(COMPUTE_DTYPE),
                  preferred_element_type=jnp.float32)         # (NH*B*S, 128)

    # c_proj (bias-free): consume the stacked ctx as per-head K=128 partial
    # matmuls summed into the (B*S, H) output -- no un-stacking relayout.
    out = jnp.dot(ctx[0:bs].astype(COMPUTE_DTYPE), wproj_ref[0:HEAD_DIM, :],
                  preferred_element_type=jnp.float32)
    for h in range(1, NUM_HEADS):                             # static unroll
        out = out + jnp.dot(
            ctx[h * bs:(h + 1) * bs].astype(COMPUTE_DTYPE),
            wproj_ref[h * HEAD_DIM:(h + 1) * HEAD_DIM, :],
            preferred_element_type=jnp.float32)
    o_ref[...] = out


# ------------------------------ module forward --------------------------------
def qwen_attention_forward(hidden_states, rotary_pos_emb_list, kparams,
                           use_cache=False):
    """hidden_states: (B, S, H) f32.  kparams holds pre-transposed bf16 weights."""
    B, S, H = hidden_states.shape
    G = B * NUM_HEADS                                         # stacked groups
    wbytes = 2 if USE_BF16_WEIGHTS else 4

    # Rotary cache (len(rotary_pos_emb_list) == 1 path of the reference code).
    cos4, sin4 = rotary_pos_emb_list[0]                       # (1, S, 1, rot_dim)
    cos2d = cos4[0, -S:, 0, :]                                # (S, rot_dim)
    sin2d = sin4[0, -S:, 0, :]
    half = HEAD_DIM // 2
    sign = jnp.concatenate([-jnp.ones((half,), jnp.float32),
                            jnp.ones((half,), jnp.float32)])
    sin_signed = sin2d * sign
    # Tile for the (head, batch, seq)-stacked SDPA layout (constant-folded).
    cos_st = jnp.tile(cos2d, (G, 1))                          # (G*S, hd)
    sin_st = jnp.tile(sin_signed, (G, 1))

    # Precomputed additive block-diagonal causal mask (constant-folded by XLA).
    idx = jnp.arange(G * S)
    blk = idx // S
    pos = idx % S
    allowed = (blk[:, None] == blk[None, :]) & (pos[None, :] <= pos[:, None])
    add_mask = jnp.where(allowed, 0.0, MASK_VALUE).astype(jnp.float32)

    x2d = hidden_states.reshape(B * S, H)

    flops = (2 * B * S * H * 3 * PROJ            # c_attn
             + 2 * (G * S) * HEAD_DIM * (G * S)  # QK^T
             + 2 * (G * S) * (G * S) * HEAD_DIM  # PV
             + 2 * B * S * PROJ * H)             # c_proj
    bytes_accessed = (B * S * H * 4                     # x
                      + H * 3 * PROJ * wbytes           # c_attn W
                      + 3 * PROJ * 4                    # c_attn b
                      + 2 * G * S * HEAD_DIM * 4        # cos, sin
                      + (G * S) * (G * S) * 4           # mask
                      + PROJ * H * wbytes               # c_proj W
                      + B * S * H * 4)                  # out

    out2d = pl.pallas_call(
        _fused_attn_kernel,
        out_shape=jax.ShapeDtypeStruct((B * S, H), jnp.float32),
        grid=(1,),
        in_specs=[
            pl.BlockSpec((B * S, H), lambda i: (0, 0)),            # x
            pl.BlockSpec((H, 3 * PROJ), lambda i: (0, 0)),         # c_attn W^T
            pl.BlockSpec((1, 3 * PROJ), lambda i: (0, 0)),         # c_attn b
            pl.BlockSpec((G * S, HEAD_DIM), lambda i: (0, 0)),     # cos (stacked)
            pl.BlockSpec((G * S, HEAD_DIM), lambda i: (0, 0)),     # signed sin
            pl.BlockSpec((G * S, G * S), lambda i: (0, 0)),        # additive mask
            pl.BlockSpec((PROJ, H), lambda i: (0, 0)),             # c_proj W^T
        ],
        out_specs=pl.BlockSpec((B * S, H), lambda i: (0, 0)),
        compiler_params=pltpu.CompilerParams(
            dimension_semantics=("arbitrary",)),
        cost_estimate=pl.CostEstimate(flops=int(flops),
                                      transcendentals=int((G * S) * (G * S)),
                                      bytes_accessed=int(bytes_accessed)),
    )(x2d, kparams["c_attn_w_t"], kparams["c_attn_b_2d"],
      cos_st, sin_st, add_mask, kparams["c_proj_w_t"])

    out = out2d.reshape(B, S, H)

    # TODO(synk): use_cache=True would need the rotary-applied K and raw V as
    # extra kernel outputs; not emitted for this (use_cache=False) config.
    present = None
    return out, present


# --------------------------- pure-JAX reference -------------------------------
def ref_forward(hidden_states, cos, sin, params):
    B, S, H = hidden_states.shape
    # Reference uses the same (bf16-quantized) weights the kernel consumes so
    # the check isolates kernel correctness from the deliberate weight cast.
    if USE_BF16_WEIGHTS:
        w_attn = params["c_attn_w"].astype(jnp.bfloat16).astype(jnp.float32)
        w_proj = params["c_proj_w"].astype(jnp.bfloat16).astype(jnp.float32)
    else:
        w_attn = params["c_attn_w"]
        w_proj = params["c_proj_w"]

    mixed = hidden_states @ w_attn.T + params["c_attn_b"]
    q, k, v = jnp.split(mixed, 3, axis=2)
    q = q.reshape(B, S, NUM_HEADS, HEAD_DIM)
    k = k.reshape(B, S, NUM_HEADS, HEAD_DIM)
    v = v.reshape(B, S, NUM_HEADS, HEAD_DIM)

    c = cos[:, -S:, :, :]
    s_ = sin[:, -S:, :, :]

    def rot_half(x):
        x1, x2 = jnp.split(x, 2, axis=-1)
        return jnp.concatenate([-x2, x1], axis=-1)

    q = q * c + rot_half(q) * s_
    k = k * c + rot_half(k) * s_

    qh = jnp.transpose(q, (0, 2, 1, 3))
    kh = jnp.transpose(k, (0, 2, 1, 3))
    vh = jnp.transpose(v, (0, 2, 1, 3))

    scores = jnp.einsum("bhqd,bhkd->bhqk", qh, kh) / math.sqrt(HEAD_DIM)
    mask = jnp.tril(jnp.ones((S, S), dtype=bool))
    scores = jnp.where(mask, scores, jnp.finfo(jnp.float32).min)
    p = jax.nn.softmax(scores, axis=-1)
    out = jnp.einsum("bhqk,bhkd->bhqd", p, vh)
    out = jnp.transpose(out, (0, 2, 1, 3)).reshape(B, S, NUM_HEADS * HEAD_DIM)
    return out @ w_proj.T


# ----------------------------------- main --------------------------------------
if __name__ == "__main__":
    key = jax.random.PRNGKey(0)
    k_x, k_w1, k_b1, k_w2 = jax.random.split(key, 4)

    hidden_states = jax.random.normal(k_x, (BATCH, SEQ, HIDDEN), jnp.float32)
    params = {
        "c_attn_w": jax.random.normal(k_w1, (3 * PROJ, HIDDEN), jnp.float32) * 0.02,
        "c_attn_b": jax.random.normal(k_b1, (3 * PROJ,), jnp.float32) * 0.02,
        "c_proj_w": jax.random.normal(k_w2, (PROJ, HIDDEN), jnp.float32) * 0.02,
    }
    # Pre-transposed (K, N) + bf16-cast kernel parameters, built ONCE at setup.
    wdtype = jnp.bfloat16 if USE_BF16_WEIGHTS else jnp.float32
    kparams = {
        "c_attn_w_t": jnp.asarray(params["c_attn_w"].T).astype(wdtype),   # (H, 3*PROJ)
        "c_attn_b_2d": params["c_attn_b"].reshape(1, 3 * PROJ),            # (1, 3*PROJ) f32
        "c_proj_w_t": jnp.asarray(params["c_proj_w"].T).astype(wdtype),   # (PROJ, H)
    }

    # Rotary cos/sin cache, same construction as QWen's RotaryEmbedding.
    inv_freq = 1.0 / (10000.0 ** (
        jnp.arange(0, HEAD_DIM, 2, dtype=jnp.float32) / HEAD_DIM))
    t = jnp.arange(SEQ, dtype=jnp.float32)
    freqs = jnp.outer(t, inv_freq)                       # (S, hd/2)
    emb = jnp.concatenate([freqs, freqs], axis=-1)       # (S, hd)
    cos = jnp.cos(emb)[None, :, None, :]                 # (1, S, 1, hd)
    sin = jnp.sin(emb)[None, :, None, :]
    rotary_pos_emb_list = [[cos, sin]]

    fwd = jax.jit(qwen_attention_forward)
    out, present = fwd(hidden_states, rotary_pos_emb_list, kparams)
    out = jax.block_until_ready(out)

    ref = ref_forward(hidden_states, cos, sin, params)
    assert out.shape == (BATCH, SEQ, HIDDEN), out.shape
    max_err = float(jnp.max(jnp.abs(out - ref)))
    # Tolerance covers the bf16 matmul-operand casts (f32 accumulation);
    # observed error is ~1e-3 at these magnitudes.
    assert jnp.allclose(out, ref, atol=1e-2, rtol=1e-2), max_err

    print("KERNEL_OK")
</pallas_src>

<mosaic_0001>
module attributes {stable_mosaic.version = 11 : i64} {
  func.func @_fused_attn_kernel(%arg0: i32, %arg1: memref<32x256xf32, #tpu.memory_space<vmem>>, %arg2: memref<256x768xbf16, #tpu.memory_space<vmem>>, %arg3: memref<1x768xf32, #tpu.memory_space<vmem>>, %arg4: memref<64x128xf32, #tpu.memory_space<vmem>>, %arg5: memref<64x128xf32, #tpu.memory_space<vmem>>, %arg6: memref<64x64xf32, #tpu.memory_space<vmem>>, %arg7: memref<256x256xbf16, #tpu.memory_space<vmem>>, %arg8: memref<32x256xf32, #tpu.memory_space<vmem>>) attributes {dimension_semantics = [#tpu.dimension_semantics<arbitrary>], iteration_bounds = array<i64: 1>, scalar_prefetch = 0 : i64, scratch_operands = 0 : i64, tpu.core_type = #tpu.core_type<tc>, window_params = [{pipeline_mode = #tpu.pipeline_mode<synchronous>, transform_indices = @transform_0, window_bounds = array<i64: 32, 256>}, {pipeline_mode = #tpu.pipeline_mode<synchronous>, transform_indices = @transform_1, window_bounds = array<i64: 256, 768>}, {pipeline_mode = #tpu.pipeline_mode<synchronous>, transform_indices = @transform_2, window_bounds = array<i64: 1, 768>}, {pipeline_mode = #tpu.pipeline_mode<synchronous>, transform_indices = @transform_3, window_bounds = array<i64: 64, 128>}, {pipeline_mode = #tpu.pipeline_mode<synchronous>, transform_indices = @transform_4, window_bounds = array<i64: 64, 128>}, {pipeline_mode = #tpu.pipeline_mode<synchronous>, transform_indices = @transform_5, window_bounds = array<i64: 64, 64>}, {pipeline_mode = #tpu.pipeline_mode<synchronous>, transform_indices = @transform_6, window_bounds = array<i64: 256, 256>}, {pipeline_mode = #tpu.pipeline_mode<synchronous>, transform_indices = @transform_7, window_bounds = array<i64: 32, 256>}]} {
    %c0 = arith.constant 0 : index
    %c0_0 = arith.constant 0 : index
    %0 = vector.load %arg1[%c0, %c0_0] : memref<32x256xf32, #tpu.memory_space<vmem>>, vector<32x256xf32>
    %1 = arith.truncf %0 : vector<32x256xf32> to vector<32x256xbf16>
    %c0_1 = arith.constant 0 : index
    %c0_2 = arith.constant 0 : index
    %2 = vector.load %arg2[%c0_1, %c0_2] : memref<256x768xbf16, #tpu.memory_space<vmem>>, vector<256x768xbf16>
    %cst = arith.constant dense<0.000000e+00> : vector<32x768xf32>
    %3 = tpu.matmul %1, %2, %cst {dimension_numbers = #tpu.dot_dimension_numbers<[1], [0], [0], [1], [0, 0, 1, 1], [], []>} : vector<32x256xbf16>, vector<256x768xbf16>, vector<32x768xf32> -> vector<32x768xf32>
    %c0_3 = arith.constant 0 : index
    %c0_4 = arith.constant 0 : index
    %4 = vector.load %arg3[%c0_3, %c0_4] : memref<1x768xf32, #tpu.memory_space<vmem>>, vector<1x768xf32>
    %5 = vector.broadcast %4 : vector<1x768xf32> to vector<32x768xf32>
    %6 = arith.addf %3, %5 : vector<32x768xf32>
    %7 = vector.extract_strided_slice %6 {offsets = [0, 0], sizes = [32, 128], strides = [1, 1]} : vector<32x768xf32> to vector<32x128xf32>
    %8 = vector.extract_strided_slice %6 {offsets = [0, 128], sizes = [32, 128], strides = [1, 1]} : vector<32x768xf32> to vector<32x128xf32>
    %9 = tpu.concatenate %7, %8 in 0 : vector<32x128xf32>, vector<32x128xf32> -> vector<64x128xf32>
    %10 = vector.extract_strided_slice %6 {offsets = [0, 256], sizes = [32, 128], strides = [1, 1]} : vector<32x768xf32> to vector<32x128xf32>
    %11 = vector.extract_strided_slice %6 {offsets = [0, 384], sizes = [32, 128], strides = [1, 1]} : vector<32x768xf32> to vector<32x128xf32>
    %12 = tpu.concatenate %10, %11 in 0 : vector<32x128xf32>, vector<32x128xf32> -> vector<64x128xf32>
    %13 = vector.extract_strided_slice %6 {offsets = [0, 512], sizes = [32, 128], strides = [1, 1]} : vector<32x768xf32> to vector<32x128xf32>
    %14 = vector.extract_strided_slice %6 {offsets = [0, 640], sizes = [32, 128], strides = [1, 1]} : vector<32x768xf32> to vector<32x128xf32>
    %15 = tpu.concatenate %13, %14 in 0 : vector<32x128xf32>, vector<32x128xf32> -> vector<64x128xf32>
    %c0_5 = arith.constant 0 : index
    %c0_6 = arith.constant 0 : index
    %16 = vector.load %arg4[%c0_5, %c0_6] : memref<64x128xf32, #tpu.memory_space<vmem>>, vector<64x128xf32>
    %c0_7 = arith.constant 0 : index
    %c0_8 = arith.constant 0 : index
    %17 = vector.load %arg5[%c0_7, %c0_8] : memref<64x128xf32, #tpu.memory_space<vmem>>, vector<64x128xf32>
    %18 = arith.mulf %9, %16 : vector<64x128xf32>
    %c64_i32 = arith.constant 64 : i32
    %19 = tpu.dynamic_rotate %9 by %c64_i32 dim 1 : vector<64x128xf32>, i32 -> vector<64x128xf32>
    %20 = arith.mulf %19, %17 : vector<64x128xf32>
    %21 = arith.addf %18, %20 : vector<64x128xf32>
    %22 = arith.mulf %12, %16 : vector<64x128xf32>
    %c64_i32_9 = arith.constant 64 : i32
    %23 = tpu.dynamic_rotate %12 by %c64_i32_9 dim 1 : vector<64x128xf32>, i32 -> vector<64x128xf32>
    %24 = arith.mulf %23, %17 : vector<64x128xf32>
    %25 = arith.addf %22, %24 : vector<64x128xf32>
    %26 = arith.truncf %21 : vector<64x128xf32> to vector<64x128xbf16>
    %27 = arith.truncf %25 : vector<64x128xf32> to vector<64x128xbf16>
    %cst_10 = arith.constant dense<0.000000e+00> : vector<64x64xf32>
    %28 = tpu.matmul %26, %27, %cst_10 {dimension_numbers = #tpu.dot_dimension_numbers<[1], [1], [0], [0], [0, 0, 1, 0], [], []>} : vector<64x128xbf16>, vector<64x128xbf16>, vector<64x64xf32> -> vector<64x64xf32>
    %cst_11 = arith.constant 0.0883883461 : f32
    %29 = vector.broadcast %cst_11 : f32 to vector<64x64xf32>
    %30 = arith.mulf %28, %29 : vector<64x64xf32>
    %c0_12 = arith.constant 0 : index
    %c0_13 = arith.constant 0 : index
    %31 = vector.load %arg6[%c0_12, %c0_13] : memref<64x64xf32, #tpu.memory_space<vmem>>, vector<64x64xf32>
    %32 = arith.addf %30, %31 : vector<64x64xf32>
    %cst_14 = arith.constant dense<0xFF800000> : vector<64xf32>
    %33 = vector.multi_reduction <maximumf>, %32, %cst_14 [1] : vector<64x64xf32> to vector<64xf32>
    %34 = vector.shape_cast %33 : vector<64xf32> to vector<64x1xf32>
    %35 = vector.broadcast %34 : vector<64x1xf32> to vector<64x64xf32>
    %36 = arith.subf %32, %35 : vector<64x64xf32>
    %37 = math.exp %36 : vector<64x64xf32>
    %cst_15 = arith.constant dense<0.000000e+00> : vector<64xf32>
    %38 = vector.multi_reduction <add>, %37, %cst_15 [1] : vector<64x64xf32> to vector<64xf32>
    %39 = vector.shape_cast %38 : vector<64xf32> to vector<64x1xf32>
    %40 = vector.broadcast %39 : vector<64x1xf32> to vector<64x64xf32>
    %41 = arith.divf %37, %40 : vector<64x64xf32>
    %42 = arith.truncf %41 : vector<64x64xf32> to vector<64x64xbf16>
    %43 = arith.truncf %15 : vector<64x128xf32> to vector<64x128xbf16>
    %cst_16 = arith.constant dense<0.000000e+00> : vector<64x128xf32>
    %44 = tpu.matmul %42, %43, %cst_16 {dimension_numbers = #tpu.dot_dimension_numbers<[1], [0], [0], [1], [0, 0, 1, 1], [], []>} : vector<64x64xbf16>, vector<64x128xbf16>, vector<64x128xf32> -> vector<64x128xf32>
    %45 = vector.extract_strided_slice %44 {offsets = [0, 0], sizes = [32, 128], strides = [1, 1]} : vector<64x128xf32> to vector<32x128xf32>
    %46 = arith.truncf %45 : vector<32x128xf32> to vector<32x128xbf16>
    %c0_17 = arith.constant 0 : index
    %c0_18 = arith.constant 0 : index
    %47 = vector.load %arg7[%c0_17, %c0_18] : memref<256x256xbf16, #tpu.memory_space<vmem>>, vector<128x256xbf16>
    %cst_19 = arith.constant dense<0.000000e+00> : vector<32x256xf32>
    %48 = tpu.matmul %46, %47, %cst_19 {dimension_numbers = #tpu.dot_dimension_numbers<[1], [0], [0], [1], [0, 0, 1, 1], [], []>} : vector<32x128xbf16>, vector<128x256xbf16>, vector<32x256xf32> -> vector<32x256xf32>
    %49 = vector.extract_strided_slice %44 {offsets = [32, 0], sizes = [32, 128], strides = [1, 1]} : vector<64x128xf32> to vector<32x128xf32>
    %50 = arith.truncf %49 : vector<32x128xf32> to vector<32x128xbf16>
    %c128 = arith.constant 128 : index
    %c0_20 = arith.constant 0 : index
    %51 = vector.load %arg7[%c128, %c0_20] : memref<256x256xbf16, #tpu.memory_space<vmem>>, vector<128x256xbf16>
    %cst_21 = arith.constant dense<0.000000e+00> : vector<32x256xf32>
    %52 = tpu.matmul %50, %51, %cst_21 {dimension_numbers = #tpu.dot_dimension_numbers<[1], [0], [0], [1], [0, 0, 1, 1], [], []>} : vector<32x128xbf16>, vector<128x256xbf16>, vector<32x256xf32> -> vector<32x256xf32>
    %53 = arith.addf %48, %52 : vector<32x256xf32>
    %c0_22 = arith.constant 0 : index
    %c0_23 = arith.constant 0 : index
    %54 = vector.load %arg8[%c0_22, %c0_23] : memref<32x256xf32, #tpu.memory_space<vmem>>, vector<32x256xf32>
    tpu.vector_store %arg8[%c0_22, %c0_23], %53 {strides = array<i32>} : memref<32x256xf32, #tpu.memory_space<vmem>>, vector<32x256xf32>,
    return
  }
  func.func @transform_0(%arg0: i32) -> (i32, i32) {
    %c0_i32 = arith.constant 0 : i32
    %c0_i32_0 = arith.constant 0 : i32
    %c0_i32_1 = arith.constant 0 : i32
    return %c0_i32, %c0_i32_0 : i32, i32
  }
  func.func @transform_1(%arg0: i32) -> (i32, i32) {
    %c0_i32 = arith.constant 0 : i32
    %c0_i32_0 = arith.constant 0 : i32
    %c0_i32_1 = arith.constant 0 : i32
    return %c0_i32, %c0_i32_0 : i32, i32
  }
  func.func @transform_2(%arg0: i32) -> (i32, i32) {
    %c0_i32 = arith.constant 0 : i32
    %c0_i32_0 = arith.constant 0 : i32
    %c0_i32_1 = arith.constant 0 : i32
    return %c0_i32, %c0_i32_0 : i32, i32
  }
  func.func @transform_3(%arg0: i32) -> (i32, i32) {
    %c0_i32 = arith.constant 0 : i32
    %c0_i32_0 = arith.constant 0 : i32
    %c0_i32_1 = arith.constant 0 : i32
    return %c0_i32, %c0_i32_0 : i32, i32
  }
  func.func @transform_4(%arg0: i32) -> (i32, i32) {
    %c0_i32 = arith.constant 0 : i32
    %c0_i32_0 = arith.constant 0 : i32
    %c0_i32_1 = arith.constant 0 : i32
    return %c0_i32, %c0_i32_0 : i32, i32
  }
  func.func @transform_5(%arg0: i32) -> (i32, i32) {
    %c0_i32 = arith.constant 0 : i32
    %c0_i32_0 = arith.constant 0 : i32
    %c0_i32_1 = arith.constant 0 : i32
    return %c0_i32, %c0_i32_0 : i32, i32
  }
  func.func @transform_6(%arg0: i32) -> (i32, i32) {
    %c0_i32 = arith.constant 0 : i32
    %c0_i32_0 = arith.constant 0 : i32
    %c0_i32_1 = arith.constant 0 : i32
    return %c0_i32, %c0_i32_0 : i32, i32
  }
  func.func @transform_7(%arg0: i32) -> (i32, i32) {
    %c0_i32 = arith.constant 0 : i32
    %c0_i32_0 = arith.constant 0 : i32
    %c0_i32_1 = arith.constant 0 : i32
    return %c0_i32, %c0_i32_0 : i32, i32
  }
}

</mosaic_0001>

<bundles_post_ra>
// kernel: qwen_attention_forward.1
= control target key start
LH: loop header
LB: loop body
LE: loop exit
PB: predicated region body
PF: predicated region fallthrough
CT: control target
= control target key end

     0   :  { %12 = vsyncpa [#allocation3], 0  ;;  %s2401_s0 = inlined_call_operand.hbm [shape: f32[32,256], index: 0, kind: input, shape index: {}]   ;;  %s2402_s1 = inlined_call_operand.hbm [shape: bf16[256,768], index: 1, kind: input, shape index: {}]   ;;  %s2403_s2 = inlined_call_operand.vmem [shape: f32[1,768], index: 2, kind: input, shape index: {}]   ;;  %s2404_s3 = inlined_call_operand.vmem [shape: f32[64,128], index: 3, kind: input, shape index: {}]   ;;  %s2405_s4 = inlined_call_operand.vmem [shape: f32[64,128], index: 4, kind: input, shape index: {}]   ;;  %s2406_s5 = inlined_call_operand.vmem [shape: f32[64,64], index: 5, kind: input, shape index: {}]   ;;  %s2407_s6 = inlined_call_operand.vmem [shape: bf16[256,256], index: 6, kind: input, shape index: {}]   ;;  %s2408_s7 = inlined_call_operand.hbm [shape: f32[32,256], index: 7, kind: output, shape index: {}]  }
   0x1   :  { %13 = vsyncpa [#allocation6], 0 }
   0x2   :  { %14 = vsyncpa [#allocation4], 0  ;;  %s2023_s24 = smov [#allocation2]   ;;  %s1951_s28 = scalar_lea.hbm %s2401_s0, 1024 }
   0x3   :  { %s20_s25 = sshll.u32 %s2023_s24, 4  ;;  %p1952_p0 = scmp.ne.s32.totalorder %s2401_s0, %s1951_s28  ;;  %s21_s25 = int_to_ptr.vmem [resolvable:$true] %s20_s25 }
   0x4   :  { %p1955_p1 = scmp.lt.u32.totalorder %s1951_s28, %s2401_s0 }
   0x6   :  { %p1957_p2 = pnand %p1955_p1, %p1952_p0 }
   0x8   :  { %1960 = shalt.err (!%p1957_p2)
}
   0x9   :  { %s1961_s10 = scalar_lea.vmem %s21_s25, 1024  ;;  %p1966_p4 = scmp.lt.s32.totalorder %s21_s25, %s21_s25 }
   0xa   :  { %p1962_p3 = scmp.ne.s32.totalorder %s21_s25, %s1961_s10  ;;  %p1967_p5 = scmp.lt.s32.totalorder %s1961_s10, %s1961_s10 }
   0xc   :  { %p1968_p6 = por %p1967_p5, %p1966_p4 }
   0xe   :  { %p1969_p7 = pnand %p1968_p6, %p1962_p3 }
  0x10   :  { %1972 = shalt.err (!%p1969_p7)
}
  0x11   :  { %s2024_s11 = smov 256   ;;  %s2025_s12 = smov 16  }
  0x12   :  { %26 = dma.hbm_to_vmem [thread:$0]  %s2401_s0, 1024, %s21_s25, [#allocation3], %s2024_s11, %s2024_s11, %s2025_s12  }
  0x13   :  { %s2026_s15 = smov [#allocation5]   ;;  %s1973_s19 = scalar_lea.hbm %s2402_s1, 12288 }
  0x14   :  { %s32_s16 = sshll.u32 %s2026_s15, 4  ;;  %p1974_p8 = scmp.ne.s32.totalorder %s2402_s1, %s1973_s19  ;;  %s33_s16 = int_to_ptr.vmem [resolvable:$true] %s32_s16 }
  0x15   :  { %p1977_p9 = scmp.lt.u32.totalorder %s1973_s19, %s2402_s1 }
  0x17   :  { %p1979_p10 = pnand %p1977_p9, %p1974_p8 }
  0x19   :  { %1982 = shalt.err (!%p1979_p10)
}
  0x1a   :  { %s1983_s24 = scalar_lea.vmem %s33_s16, 12288  ;;  %p1988_p12 = scmp.lt.s32.totalorder %s33_s16, %s33_s16 }
  0x1b   :  { %p1984_p11 = scmp.ne.s32.totalorder %s33_s16, %s1983_s24  ;;  %p1989_p13 = scmp.lt.s32.totalorder %s1983_s24, %s1983_s24 }
  0x1d   :  { %p1990_p0 = por %p1989_p13, %p1988_p12 }
  0x1f   :  { %p1991_p1 = pnand %p1990_p0, %p1984_p11 }
  0x21   :  { %1994 = shalt.err (!%p1991_p1)
}
  0x22   :  { %s2027_s0 = smov 384   ;;  %s2028_s25 = smov 24  }
  0x23   :  { %38 = dma.hbm_to_vmem [thread:$0]  %s2402_s1, 12288, %s33_s16, [#allocation6], %s2027_s0, %s2027_s0, %s2028_s25  }
  0x24   :  { %2017 = dma.done.wait [#allocation3], 1024  }
  0x25   :  { %2018 = vsyncadd [#allocation3], 4294966272 }
  0x26   :  { %2019 = dma.done.wait [#allocation6], 12288  }
  0x27   :  { %2020 = vsyncadd [#allocation6], 4294955008  ;;  %v1727_v0 = vld [vmem:[#allocation5 + $0xc] ss:$24 sps:$4 sm:$0xff]   ;;  %v1729_v1 = vld [vmem:[#allocation5 + $0x8] ss:$24 sps:$4 sm:$0xff]  }
  0x28   :  { %729 = vmatprep.subr.bf16.mxu1 %v1727_v0  ;;  %v1730_v2 = vld [vmem:[#allocation5 + $0x3c] ss:$24 sps:$4 sm:$0xff]   ;;  %v1732_v3 = vld [vmem:[#allocation5 + $0x38] ss:$24 sps:$4 sm:$0xff]   ;;  %v1733_v4 = vld [vmem:[#allocation5 + $0x6c] ss:$24 sps:$4 sm:$0xff]  }
  0x29   :  { %730 = vmatpush1.bf16.msra.mxu1 %v1729_v1  ;;  %v1736_v5 = vld [vmem:[#allocation5 + $0x4] ss:$24 sps:$4 sm:$0xff]   ;;  %v1735_v6 = vld [vmem:[#allocation5 + $0x68] ss:$24 sps:$4 sm:$0xff]   ;;  %v1742_v8 = vld [vmem:[#allocation5 + $0x34] ss:$24 sps:$4 sm:$0xff]  }
  0x2a   :  { %731 = vmatprep.subr.bf16.mxu1 %v1730_v2  ;;  %676 = vmatprep.subr.bf16.mxu0 %v1736_v5  ;;  %v1740_v7 = vld [vmem:[#allocation5] ss:$24 sps:$4 sm:$0xff]   ;;  %v1738_v9 = vld [vmem:[#allocation5 + $0x9c] ss:$24 sps:$4 sm:$0xff]   ;;  %v1746_v10 = vld [vmem:[#allocation5 + $0x30] ss:$24 sps:$4 sm:$0xff]  }
  0x2b   :  { %677 = vmatpush1.bf16.msra.mxu0 %v1740_v7  ;;  %v1748_v11 = vld [vmem:[#allocation5 + $0x64] ss:$24 sps:$4 sm:$0xff]   ;;  %v1741_v12 = vld [vmem:[#allocation5 + $0x98] ss:$24 sps:$4 sm:$0xff]   ;;  %v1754_v15 = vld [vmem:[#allocation5 + $0x94] ss:$24 sps:$4 sm:$0xff]  }
  0x2c   :  { %678 = vmatprep.subr.bf16.mxu0 %v1742_v8  ;;  %v1744_v13 = vld [vmem:[#allocation5 + $0xcc] ss:$24 sps:$4 sm:$0xff]   ;;  %v1752_v14 = vld [vmem:[#allocation5 + $0x60] ss:$24 sps:$4 sm:$0xff]   ;;  %v1750_v17 = vld [vmem:[#allocation5 + $0xfc] ss:$24 sps:$4 sm:$0xff]  }
  0x2d   :  { %732 = vmatpush1.bf16.msra.mxu1 %v1732_v3  ;;  %v1747_v16 = vld [vmem:[#allocation5 + $0xc8] ss:$24 sps:$4 sm:$0xff]   ;;  %v1760_v19 = vld [vmem:[#allocation5 + $0xc4] ss:$24 sps:$4 sm:$0xff]   ;;  %v1753_v20 = vld [vmem:[#allocation5 + $0xf8] ss:$24 sps:$4 sm:$0xff]  }
  0x2e   :  { %733 = vmatprep.subr.bf16.mxu1 %v1733_v4  ;;  %v1758_v18 = vld [vmem:[#allocation5 + $0x90] ss:$24 sps:$4 sm:$0xff]   ;;  %v1756_v21 = vld [vmem:[#allocation5 + $0x12c] ss:$24 sps:$4 sm:$0xff]   ;;  %v1764_v22 = vld [vmem:[#allocation5 + $0xc0] ss:$24 sps:$4 sm:$0xff]  }
  0x2f   :  { %679 = vmatpush1.bf16.msra.mxu0 %v1746_v10  ;;  %v1766_v23 = vld [vmem:[#allocation5 + $0xf4] ss:$24 sps:$4 sm:$0xff]   ;;  %v1759_v24 = vld [vmem:[#allocation5 + $0x128] ss:$24 sps:$4 sm:$0xff]   ;;  %v1772_v27 = vld [vmem:[#allocation5 + $0x124] ss:$24 sps:$4 sm:$0xff]  }
  0x30   :  { %680 = vmatprep.subr.bf16.mxu0 %v1748_v11  ;;  %v1762_v25 = vld [vmem:[#allocation5 + $0x15c] ss:$24 sps:$4 sm:$0xff]   ;;  %v1770_v26 = vld [vmem:[#allocation5 + $0xf0] ss:$24 sps:$4 sm:$0xff]   ;;  %v1768_v29 = vld [vmem:[#allocation5 + $0x18c] ss:$24 sps:$4 sm:$0xff]  }
  0x31   :  { %734 = vmatpush1.bf16.msra.mxu1 %v1735_v6  ;;  %v1765_v28 = vld [vmem:[#allocation5 + $0x158] ss:$24 sps:$4 sm:$0xff]   ;;  %v1778_v31 = vld [vmem:[#allocation5 + $0x154] ss:$24 sps:$4 sm:$0xff]   ;;  %v1771_v32 = vld [vmem:[#allocation5 + $0x188] ss:$24 sps:$4 sm:$0xff]  }
  0x32   :  { %735 = vmatprep.subr.bf16.mxu1 %v1738_v9  ;;  %v1776_v30 = vld [vmem:[#allocation5 + $0x120] ss:$24 sps:$4 sm:$0xff]   ;;  %v1774_v33 = vld [vmem:[#allocation5 + $0x1bc] ss:$24 sps:$4 sm:$0xff]   ;;  %v1782_v34 = vld [vmem:[#allocation5 + $0x150] ss:$24 sps:$4 sm:$0xff]  }
  0x33   :  { %681 = vmatpush1.bf16.msra.mxu0 %v1752_v14  ;;  %v1784_v35 = vld [vmem:[#allocation5 + $0x184] ss:$24 sps:$4 sm:$0xff]   ;;  %v1777_v36 = vld [vmem:[#allocation5 + $0x1b8] ss:$24 sps:$4 sm:$0xff]   ;;  %v1790_v39 = vld [vmem:[#allocation5 + $0x1b4] ss:$24 sps:$4 sm:$0xff]  }
  0x34   :  { %682 = vmatprep.subr.bf16.mxu0 %v1754_v15  ;;  %v1780_v37 = vld [vmem:[#allocation5 + $0x1ec] ss:$24 sps:$4 sm:$0xff]   ;;  %v1788_v38 = vld [vmem:[#allocation5 + $0x180] ss:$24 sps:$4 sm:$0xff]   ;;  %v1786_v43 = vld [vmem:[#allocation5 + $0x21c] ss:$24 sps:$4 sm:$0xff]  }
  0x35   :  { %736 = vmatpush1.bf16.msra.mxu1 %v1741_v12  ;;  %v1783_v40 = vld [vmem:[#allocation5 + $0x1e8] ss:$24 sps:$4 sm:$0xff]   ;;  %v59_v42 = vld [vmem:[#allocation2 + $0x18] sm:$0xff]  ;;  %v1792_v48 = vld [vmem:[#allocation5 + $0x24c] ss:$24 sps:$4 sm:$0xff]   ;;  %s2029_s29 = smov 64  }
  0x36   :  { %737 = vmatprep.subr.bf16.mxu1 %v1744_v13  ;;  %v57_v41 = vld [vmem:[#allocation2 + $0x8] sm:$0xff]  ;;  %v1796_v46 = vld [vmem:[#allocation5 + $0x1e4] ss:$24 sps:$4 sm:$0xff]   ;;  %v1789_v47 = vld [vmem:[#allocation5 + $0x218] ss:$24 sps:$4 sm:$0xff]   ;;  %vm1028_vm0 = vcmask 523264  }
  0x37   :  { %683 = vmatpush1.bf16.msra.mxu0 %v1758_v18  ;;  %v1794_v44 = vld [vmem:[#allocation5 + $0x1b0] ss:$24 sps:$4 sm:$0xff]   ;;  %v2099_v45 = vpack.c.bf16 %v59_v42, %v57_v41  ;;  %v1800_v49 = vld [vmem:[#allocation5 + $0x1e0] ss:$24 sps:$4 sm:$0xff]   ;;  %v1802_v51 = vld [vmem:[#allocation5 + $0x214] ss:$24 sps:$4 sm:$0xff]  }
  0x38   :  { %684 = vmatprep.subr.bf16.mxu0 %v1760_v19  ;;  %v1795_v50 = vld [vmem:[#allocation5 + $0x248] ss:$24 sps:$4 sm:$0xff]   ;;  %v1798_v52 = vld [vmem:[#allocation5 + $0x27c] ss:$24 sps:$4 sm:$0xff]   ;;  %v1801_v55 = vld [vmem:[#allocation5 + $0x278] ss:$24 sps:$4 sm:$0xff]  }
  0x39   :  { %738 = vmatpush1.bf16.msra.mxu1 %v1747_v16  ;;  %761 = vmatprep.mubr.bf16.mxu1 %v2099_v45  ;;  %v1806_v53 = vld [vmem:[#allocation5 + $0x210] ss:$24 sps:$4 sm:$0xff]   ;;  %v1808_v54 = vld [vmem:[#allocation5 + $0x244] ss:$24 sps:$4 sm:$0xff]   ;;  %v1812_v57 = vld [vmem:[#allocation5 + $0x240] ss:$24 sps:$4 sm:$0xff]  }
  0x3a   :  { %739 = vmatprep.subr.bf16.mxu1 %v1750_v17  ;;  %708 = vmatprep.mubr.bf16.mxu0 %v2099_v45  ;;  %v1804_v56 = vld [vmem:[#allocation5 + $0x2ac] ss:$24 sps:$4 sm:$0xff]   ;;  %v1807_v59 = vld [vmem:[#allocation5 + $0x2a8] ss:$24 sps:$4 sm:$0xff]   ;;  %v1810_v60 = vld [vmem:[#allocation5 + $0x2dc] ss:$24 sps:$4 sm:$0xff]  }
  0x3b   :  { %685 = vmatpush1.bf16.msra.mxu0 %v1764_v22  ;;  %v1814_v58 = vld [vmem:[#allocation5 + $0x274] ss:$24 sps:$4 sm:$0xff]   ;;  %v1816_v61 = vld [vmem:[#allocation5 + $0x270] ss:$24 sps:$4 sm:$0xff]   ;;  %v1817_v62 = vld [vmem:[#allocation5 + $0x2a4] ss:$24 sps:$4 sm:$0xff]  }
  0x3c   :  { %686 = vmatprep.subr.bf16.mxu0 %v1766_v23  ;;  %v1813_v63 = vld [vmem:[#allocation5 + $0x2d8] ss:$24 sps:$4 sm:$0xff]   ;;  %v56_v0 = vld [vmem:[#allocation2] sm:$0xff]  ;;  %v61_v3 = vld [vmem:[#allocation2 + $0x28] sm:$0xff]  ;;  %s2031_s15 = smov [#allocation7]  }
  0x3d   :  { %740 = vmatpush1.bf16.msra.mxu1 %v1753_v20  ;;  %v58_v1 = vld [vmem:[#allocation2 + $0x10] sm:$0xff]  ;;  %v1819_v2 = vld [vmem:[#allocation5 + $0x2a0] ss:$24 sps:$4 sm:$0xff]   ;;  %v1828_v14 = vld [vmem:[#allocation5 + $0x44] ss:$24 sps:$4 sm:$0xff]  }
  0x3e   :  { %741 = vmatprep.subr.bf16.mxu1 %v1756_v21  ;;  %v63_v4 = vld [vmem:[#allocation2 + $0x38] sm:$0xff]  ;;  %v1820_v5 = vld [vmem:[#allocation5 + $0x2d4] ss:$24 sps:$4 sm:$0xff]   ;;  %v2103_v6 = vpack.c.bf16 %v58_v1, %v56_v0  ;;  %v1822_v7 = vld [vmem:[#allocation5 + $0x2d0] ss:$24 sps:$4 sm:$0xff]  }
  0x3f   :  { %687 = vmatpush1.bf16.msra.mxu0 %v1770_v26  ;;  %v2105_v8 = vpack.c.bf16 %v63_v4, %v61_v3  ;;  %v60_v9 = vld [vmem:[#allocation2 + $0x20] sm:$0xff]  ;;  %v62_v10 = vld [vmem:[#allocation2 + $0x30] sm:$0xff] }
  0x40   :  { %688 = vmatprep.subr.bf16.mxu0 %v1772_v27  ;;  %v2109_v11 = vpack.c.bf16 %v62_v10, %v60_v9  ;;  %v1823_v12 = vld [vmem:[#allocation5 + $0x10] ss:$24 sps:$4 sm:$0xff]   ;;  %v1825_v13 = vld [vmem:[#allocation5 + $0x14] ss:$24 sps:$4 sm:$0xff]   ;;  %v1826_v15 = vld [vmem:[#allocation5 + $0x40] ss:$24 sps:$4 sm:$0xff]  }
  0x41   :  { %742 = vmatpush1.bf16.msra.mxu1 %v1759_v24  ;;  %v1831_v16 = vld [vmem:[#allocation5 + $0x74] ss:$24 sps:$4 sm:$0xff]   ;;  %v1829_v17 = vld [vmem:[#allocation5 + $0x70] ss:$24 sps:$4 sm:$0xff]   ;;  %v1834_v18 = vld [vmem:[#allocation5 + $0xa4] ss:$24 sps:$4 sm:$0xff]  }
  0x42   :  { %743 = vmatprep.subr.bf16.mxu1 %v1762_v25  ;;  %v1832_v19 = vld [vmem:[#allocation5 + $0xa0] ss:$24 sps:$4 sm:$0xff]   ;;  %v1837_v20 = vld [vmem:[#allocation5 + $0xd4] ss:$24 sps:$4 sm:$0xff]   ;;  %v1835_v21 = vld [vmem:[#allocation5 + $0xd0] ss:$24 sps:$4 sm:$0xff]  }
  0x43   :  { %689 = vmatpush1.bf16.msra.mxu0 %v1776_v30  ;;  %v1840_v22 = vld [vmem:[#allocation5 + $0x104] ss:$24 sps:$4 sm:$0xff]   ;;  %v1838_v23 = vld [vmem:[#allocation5 + $0x100] ss:$24 sps:$4 sm:$0xff]   ;;  %v1843_v24 = vld [vmem:[#allocation5 + $0x134] ss:$24 sps:$4 sm:$0xff]  }
  0x44   :  { %690 = vmatprep.subr.bf16.mxu0 %v1778_v31  ;;  %v1841_v25 = vld [vmem:[#allocation5 + $0x130] ss:$24 sps:$4 sm:$0xff]   ;;  %v1846_v26 = vld [vmem:[#allocation5 + $0x164] ss:$24 sps:$4 sm:$0xff]   ;;  %v1844_v27 = vld [vmem:[#allocation5 + $0x160] ss:$24 sps:$4 sm:$0xff]  }
  0x45   :  { %744 = vmatpush1.bf16.msra.mxu1 %v1765_v28  ;;  %v1849_v28 = vld [vmem:[#allocation5 + $0x194] ss:$24 sps:$4 sm:$0xff]   ;;  %v1852_v30 = vld [vmem:[#allocation5 + $0x1c4] ss:$24 sps:$4 sm:$0xff]   ;;  %v1850_v31 = vld [vmem:[#allocation5 + $0x1c0] ss:$24 sps:$4 sm:$0xff]  }
  0x46   :  { %745 = vmatprep.subr.bf16.mxu1 %v1768_v29  ;;  %v1847_v29 = vld [vmem:[#allocation5 + $0x190] ss:$24 sps:$4 sm:$0xff]   ;;  %v1870_v42 = vld [vmem:[#allocation5 + $0x2e4] ss:$24 sps:$4 sm:$0xff]  }
  0x47   :  { %691 = vmatpush1.bf16.msra.mxu0 %v1782_v34  ;;  %v1858_v34 = vld [vmem:[#allocation5 + $0x224] ss:$24 sps:$4 sm:$0xff]   ;;  %v1865_v41 = vld [vmem:[#allocation5 + $0x2b0] ss:$24 sps:$4 sm:$0xff]  }
  0x48   :  { %692 = vmatprep.subr.bf16.mxu0 %v1784_v35  ;;  %v1856_v35 = vld [vmem:[#allocation5 + $0x220] ss:$24 sps:$4 sm:$0xff]  }
  0x49   :  { %746 = vmatpush1.bf16.msra.mxu1 %v1771_v32  ;;  %v1855_v32 = vld [vmem:[#allocation5 + $0x1f4] ss:$24 sps:$4 sm:$0xff]  }
  0x4a   :  { %747 = vmatprep.subr.bf16.mxu1 %v1774_v33  ;;  %v1853_v33 = vld [vmem:[#allocation5 + $0x1f0] ss:$24 sps:$4 sm:$0xff]  }
  0x4b   :  { %693 = vmatpush1.bf16.msra.mxu0 %v1788_v38  ;;  %v1864_v38 = vld [vmem:[#allocation5 + $0x284] ss:$24 sps:$4 sm:$0xff]  }
  0x4c   :  { %694 = vmatprep.subr.bf16.mxu0 %v1790_v39  ;;  %v1862_v39 = vld [vmem:[#allocation5 + $0x280] ss:$24 sps:$4 sm:$0xff]  }
  0x4d   :  { %748 = vmatpush1.bf16.msra.mxu1 %v1777_v36  ;;  %v1861_v36 = vld [vmem:[#allocation5 + $0x254] ss:$24 sps:$4 sm:$0xff]  }
  0x4e   :  { %749 = vmatprep.subr.bf16.mxu1 %v1780_v37  ;;  %v1859_v37 = vld [vmem:[#allocation5 + $0x250] ss:$24 sps:$4 sm:$0xff]  }
  0x4f   :  { %695 = vmatpush1.bf16.msra.mxu0 %v1794_v44  ;;  %v166_v44 = vlaneseq }
  0x50   :  { %696 = vmatprep.subr.bf16.mxu0 %v1796_v46 }
  0x51   :  { %750 = vmatpush1.bf16.msra.mxu1 %v1783_v40  ;;  %v1867_v40 = vld [vmem:[#allocation5 + $0x2b4] ss:$24 sps:$4 sm:$0xff]  }
  0x52   :  { %751 = vmatprep.subr.bf16.mxu1 %v1786_v43  ;;  %v1868_v43 = vld [vmem:[#allocation5 + $0x2e0] ss:$24 sps:$4 sm:$0xff]  }
  0x53   :  { %697 = vmatpush1.bf16.msra.mxu0 %v1800_v49 }
  0x54   :  { %698 = vmatprep.subr.bf16.mxu0 %v1802_v51 }
  0x55   :  { %752 = vmatpush1.bf16.msra.mxu1 %v1789_v47  ;;  %v2125_v47 = vld [vmem:[%s2403_s2] sm:$0x3f] }
  0x56   :  { %753 = vmatprep.subr.bf16.mxu1 %v1792_v48 }
  0x57   :  { %699 = vmatpush1.bf16.msra.mxu0 %v1806_v53 }
  0x58   :  { %700 = vmatprep.subr.bf16.mxu0 %v1808_v54 }
  0x59   :  { %754 = vmatpush1.bf16.msra.mxu1 %v1795_v50 }
  0x5a   :  { %755 = vmatprep.subr.bf16.mxu1 %v1798_v52 }
  0x5b   :  { %701 = vmatpush1.bf16.msra.mxu0 %v1812_v57 }
  0x5c   :  { %702 = vmatprep.subr.bf16.mxu0 %v1814_v58 }
  0x5d   :  { %756 = vmatpush1.bf16.msra.mxu1 %v1801_v55 }
  0x5e   :  { %757 = vmatprep.subr.bf16.mxu1 %v1804_v56 }
  0x5f   :  { %703 = vmatpush1.bf16.msra.mxu0 %v1816_v61 }
  0x60   :  { %704 = vmatprep.subr.bf16.mxu0 %v1817_v62 }
  0x61   :  { %758 = vmatpush1.bf16.msra.mxu1 %v1807_v59 }
  0x62   :  { %759 = vmatprep.subr.bf16.mxu1 %v1810_v60 }
  0x63   :  { %705 = vmatpush1.bf16.msra.mxu0 %v1819_v2 }
  0x64   :  { %706 = vmatprep.subr.bf16.mxu0 %v1820_v5 }
  0x65   :  { %760 = vmatpush1.bf16.msra.mxu1 %v1813_v63 }
  0x67   :  { %707 = vmatpush1.bf16.msra.mxu0 %v1822_v7 }
  0x68   :  { %762 = vmatmul.mubr.bf16.vlgmr.msra.gmra.mrb[0].mxu1 %v2103_v6  ;;  %782 = vmatprep.subr.bf16.mxu0 %v1825_v13 }
  0x69   :  { %771 = vmatprep.mubr.bf16.mxu1 %v2105_v8 }
  0x6a   :  { %709 = vmatmul.mubr.bf16.vlgmr.msra.gmra.mrb[0].mxu0 %v2103_v6 }
  0x6b   :  { %718 = vmatprep.mubr.bf16.mxu0 %v2105_v8  ;;  %783 = vmatpush1.bf16.msra.mxu0 %v1823_v12 }
  0x6c   :  { %784 = vmatprep.subr.bf16.mxu0 %v1828_v14 }
  0x6f   :  { %785 = vmatpush1.bf16.msra.mxu0 %v1826_v15 }
  0x70   :  { %772 = vmatmul.mubr.bf16.gmra.mrb[4].mxu1 %v2109_v11  ;;  %786 = vmatprep.subr.bf16.mxu0 %v1831_v16 }
  0x72   :  { %719 = vmatmul.mubr.bf16.gmra.mrb[4].mxu0 %v2109_v11 }
  0x73   :  { %814 = vmatprep.mubr.bf16.mxu0 %v2099_v45  ;;  %787 = vmatpush1.bf16.msra.mxu0 %v1829_v17  ;;  %v2119_v45 = vshrl.u32 %v166_v44, 7 }
  0x74   :  { %788 = vmatprep.subr.bf16.mxu0 %v1834_v18 }
  0x75   :  { %v176_v46 = vsub.s32 2, %v2119_v45  ;;  %v180_v51 = vsub.s32 3, %v2119_v45  ;;  %v168_v59 = vsub.s32 0, %v2119_v45  ;;  %v172_v10 = vsub.s32 1, %v2119_v45 }
  0x77   :  { %789 = vmatpush1.bf16.msra.mxu0 %v1832_v19  ;;  %v177_v48 = vrot.slane %v2125_v47, %v176_v46  ;;  %v181_v55 = vrot.slane %v2125_v47, %v180_v51  ;;  %v169_v4 = vrot.slane %v2125_v47, %v168_v59  ;;  %v173_v14 = vrot.slane %v2125_v47, %v172_v10  ;;  %v839_v51 = vld [vmem:[%s2404_s3 + $0x20] sm:$0xff] }
  0x78   :  { %790 = vmatprep.subr.bf16.mxu0 %v1837_v20 }
  0x7b   :  { %791 = vmatpush1.bf16.msra.mxu0 %v1835_v21 }
  0x7c   :  { %792 = vmatprep.subr.bf16.mxu0 %v1840_v22 }
  0x7f   :  { %793 = vmatpush1.bf16.msra.mxu0 %v1838_v23  ;;  %v843_v23 = vld [vmem:[%s2405_s4] sm:$0xff] }
  0x80   :  { %794 = vmatprep.subr.bf16.mxu0 %v1843_v24 }
  0x83   :  { %795 = vmatpush1.bf16.msra.mxu0 %v1841_v25  ;;  %v835_v25 = vld [vmem:[%s2404_s3] sm:$0xff] }
  0x84   :  { %796 = vmatprep.subr.bf16.mxu0 %v1846_v26  ;;  %v836_v26 = vld [vmem:[%s2404_s3 + $0x8] sm:$0xff] }
  0x87   :  { %797 = vmatpush1.bf16.msra.mxu0 %v1844_v27  ;;  %v844_v27 = vld [vmem:[%s2405_s4 + $0x8] sm:$0xff] }
  0x88   :  { %798 = vmatprep.subr.bf16.mxu0 %v1849_v28 }
  0x8b   :  { %799 = vmatpush1.bf16.msra.mxu0 %v1847_v29 }
  0x8c   :  { %800 = vmatprep.subr.bf16.mxu0 %v1852_v30 }
  0x8f   :  { %801 = vmatpush1.bf16.msra.mxu0 %v1850_v31 }
  0x90   :  { %802 = vmatprep.subr.bf16.mxu0 %v1855_v32 }
  0x93   :  { %803 = vmatpush1.bf16.msra.mxu0 %v1853_v33 }
  0x94   :  { %804 = vmatprep.subr.bf16.mxu0 %v1858_v34 }
  0x97   :  { %805 = vmatpush1.bf16.msra.mxu0 %v1856_v35  ;;  %v845_v35 = vld [vmem:[%s2405_s4 + $0x10] sm:$0xff] }
  0x98   :  { %806 = vmatprep.subr.bf16.mxu0 %v1861_v36 }
  0x9b   :  { %807 = vmatpush1.bf16.msra.mxu0 %v1859_v37 }
  0x9c   :  { %808 = vmatprep.subr.bf16.mxu0 %v1864_v38 }
  0x9f   :  { %809 = vmatpush1.bf16.msra.mxu0 %v1862_v39  ;;  %v837_v39 = vld [vmem:[%s2404_s3 + $0x10] sm:$0xff] }
  0xa0   :  { %810 = vmatprep.subr.bf16.mxu0 %v1867_v40  ;;  %v838_v40 = vld [vmem:[%s2404_s3 + $0x18] sm:$0xff] }
  0xa3   :  { %811 = vmatpush1.bf16.msra.mxu0 %v1865_v41  ;;  %v846_v41 = vld [vmem:[%s2405_s4 + $0x18] sm:$0xff] }
  0xa4   :  { %812 = vmatprep.subr.bf16.mxu0 %v1870_v42 }
  0xa7   :  { %813 = vmatpush1.bf16.msra.mxu0 %v1868_v43  ;;  %v847_v43 = vld [vmem:[%s2405_s4 + $0x20] sm:$0xff] }
  0xaa   :  { %815 = vmatmul.mubr.bf16.vlgmr.msra.gmra.mrb[8].mxu0 %v2103_v6 }
  0xab   :  { %824 = vmatprep.mubr.bf16.mxu0 %v2105_v8 }
  0xb2   :  { %825 = vmatmul.mubr.bf16.gmra.mrb[12].mxu0 %v2109_v11 }
 0x13b   :  { %v763_v49 = vpop.f32.mrb[0].mxu1 }
 0x13c   :  { %v764_v50 = vadd.f32 %v763_v49, %v177_v48  ;;  %v765_v52 = vpop.f32.mrb[1].mxu1 }
 0x13d   :  { %v767_v53 = vpop.f32.mrb[2].mxu1  ;;  %v710_v57 = vpop.f32.mrb[0].mxu0  ;;  %v2133_v63 = vadd.f32 %v765_v52, %v181_v55  ;;  %v840_v52 = vld [vmem:[%s2404_s3 + $0x28] sm:$0xff] }
 0x13e   :  { %v769_v54 = vpop.f32.mrb[3].mxu1  ;;  %899 = vrot.lane.b32.xlu0 %v764_v50, %s2029_s29  ;;  %v768_v56 = vadd.f32 %v767_v53, %v177_v48  ;;  %v712_v58 = vpop.f32.mrb[1].mxu0  ;;  %v2144_v9 = vadd.f32 %v710_v57, %v169_v4  ;;  %v891_v30 = vmul.f32 %v835_v25, %v764_v50  ;;  %v848_v53 = vld [vmem:[%s2405_s4 + $0x28] sm:$0xff]  ;;  %v849_v57 = vld [vmem:[%s2405_s4 + $0x30] sm:$0xff] }
 0x13f   :  { %v714_v60 = vpop.f32.mrb[2].mxu0  ;;  %v770_v13 = vadd.f32 %v769_v54, %v181_v55  ;;  %v2155_v17 = vadd.f32 %v712_v58, %v173_v14 }
 0x140   :  { %v716_v62 = vpop.f32.mrb[3].mxu0  ;;  %v2157_v18 = vadd.f32 %v714_v60, %v169_v4  ;;  %v892_v31 = vmul.f32 %v836_v26, %v768_v56  ;;  %v895_v60 = vmul.f32 %v839_v51, %v2133_v63 }
 0x141   :  { %v2175_v21 = vadd.f32 %v716_v62, %v173_v14 }
 0x142   :  { %901 = vrot.lane.b32.xlu0 %v768_v56, %s2029_s29 }
 0x143   :  { %v773_v61 = vpop.f32.mrb[4].mxu1 }
 0x144   :  { %v774_v0 = vadd.f32 %v773_v61, %v177_v48  ;;  %v775_v1 = vpop.f32.mrb[5].mxu1  ;;  %v896_v61 = vmul.f32 %v840_v52, %v770_v13 }
 0x145   :  { %v777_v2 = vpop.f32.mrb[6].mxu1  ;;  %v2139_v5 = vadd.f32 %v775_v1, %v181_v55  ;;  %v720_v7 = vpop.f32.mrb[4].mxu0  ;;  %v841_v1 = vld [vmem:[%s2404_s3 + $0x30] sm:$0xff] }
 0x146   :  { %v779_v3 = vpop.f32.mrb[7].mxu1  ;;  %903 = vrot.lane.b32.xlu1 %v774_v0, %s2029_s29  ;;  %907 = vrot.lane.b32.xlu0 %v2133_v63, %s2029_s29  ;;  %v778_v6 = vadd.f32 %v777_v2, %v177_v48  ;;  %v722_v8 = vpop.f32.mrb[5].mxu0  ;;  %v2151_v15 = vadd.f32 %v720_v7, %v169_v4  ;;  %v893_v48 = vmul.f32 %v837_v39, %v774_v0  ;;  %v842_v2 = vld [vmem:[%s2404_s3 + $0x38] sm:$0xff]  ;;  %s1517_s3 = sshll.u32 %s2031_s15, 4  ;;  %s1518_s3 = int_to_ptr.vmem [resolvable:$true] %s1517_s3 }
 0x147   :  { %v724_v11 = vpop.f32.mrb[6].mxu0  ;;  %v2153_v16 = vadd.f32 %v779_v3, %v181_v55  ;;  %v2163_v19 = vadd.f32 %v722_v8, %v173_v14  ;;  %v850_v3 = vld [vmem:[%s2405_s4 + $0x38] sm:$0xff]  ;;  %v897_v10 = vmul.f32 %v841_v1, %v2139_v5  ;;  %p2000_p3 = scmp.lt.s32.totalorder %s1518_s3, %s1518_s3 }
 0x148   :  { %v726_v12 = vpop.f32.mrb[7].mxu0  ;;  %v2169_v20 = vadd.f32 %v724_v11, %v169_v4  ;;  %v894_v49 = vmul.f32 %v838_v40, %v778_v6 }
 0x149   :  { %v2179_v22 = vadd.f32 %v726_v12, %v173_v14  ;;  %v898_v11 = vmul.f32 %v842_v2, %v2153_v16 }
 0x14a   :  { %905 = vrot.lane.b32.xlu1 %v778_v6, %s2029_s29  ;;  %911 = vrot.lane.b32.xlu0 %v2139_v5, %s2029_s29 }
 0x14e   :  { %909 = vrot.lane.b32.xlu1 %v770_v13, %s2029_s29  ;;  %859 = vrot.lane.b32.xlu0 %v2144_v9, %s2029_s29 }
 0x152   :  { %913 = vrot.lane.b32.xlu1 %v2153_v16, %s2029_s29  ;;  %863 = vrot.lane.b32.xlu0 %v2151_v15, %s2029_s29  ;;  %v853_v16 = vmul.f32 %v837_v39, %v2151_v15  ;;  %v857_v39 = vmul.f32 %v841_v1, %v2163_v19 }
 0x156   :  { %861 = vrot.lane.b32.xlu1 %v2157_v18, %s2029_s29  ;;  %867 = vrot.lane.b32.xlu0 %v2155_v17, %s2029_s29 }
 0x15a   :  { %865 = vrot.lane.b32.xlu1 %v2169_v20, %s2029_s29  ;;  %871 = vrot.lane.b32.xlu0 %v2163_v19, %s2029_s29 }
 0x15e   :  { %869 = vrot.lane.b32.xlu1 %v2175_v21, %s2029_s29 }
 0x162   :  { %873 = vrot.lane.b32.xlu1 %v2179_v22, %s2029_s29 }
 0x1b0   :  { %v900_v24 = vpop.permute.xlu0 %899 }
 0x1b1   :  { %v915_v28 = vmul.f32 %v900_v24, %v843_v23 }
 0x1b3   :  { %v923_v33 = vadd.f32 %v915_v28, %v891_v30  ;;  %v851_v30 = vmul.f32 %v835_v25, %v2144_v9 }
 0x1b4   :  { %v902_v29 = vpop.permute.xlu0 %901 }
 0x1b5   :  { %v916_v32 = vmul.f32 %v902_v29, %v844_v27 }
 0x1b7   :  { %v924_v34 = vadd.f32 %v916_v32, %v892_v31  ;;  %v852_v31 = vmul.f32 %v836_v26, %v2157_v18  ;;  %v855_v26 = vmul.f32 %v839_v51, %v2155_v17  ;;  %v184_v17 = vsub.s32 4, %v2119_v45 }
 0x1b8   :  { %v904_v36 = vpop.permute.xlu1 %903  ;;  %v908_v37 = vpop.permute.xlu0 %907 }
 0x1b9   :  { %v935_v38 = vpack.c.bf16 %v924_v34, %v923_v33  ;;  %v917_v42 = vmul.f32 %v904_v36, %v845_v35  ;;  %v919_v55 = vmul.f32 %v908_v37, %v847_v43  ;;  %v185_v51 = vrot.slane %v2125_v47, %v184_v17 }
 0x1bb   :  { %1678 = vmatprep.subr.bf16.mxu0 %v935_v38  ;;  %v925_v54 = vadd.f32 %v917_v42, %v893_v48  ;;  %v927_v4 = vadd.f32 %v919_v55, %v895_v60  ;;  %v854_v42 = vmul.f32 %v838_v40, %v2169_v20  ;;  %v858_v40 = vmul.f32 %v842_v2, %v2179_v22 }
 0x1bc   :  { %v906_v44 = vpop.permute.xlu1 %905  ;;  %v912_v46 = vpop.permute.xlu0 %911  ;;  %1679 = vmatpush3.bf16.xpose.msra.mxu0 %v935_v38 }
 0x1bd   :  { %v918_v50 = vmul.f32 %v906_v44, %v846_v41  ;;  %v921_v6 = vmul.f32 %v912_v46, %v849_v57 }
 0x1bf   :  { %v926_v56 = vadd.f32 %v918_v50, %v894_v49  ;;  %v929_v14 = vadd.f32 %v921_v6, %v897_v10 }
 0x1c0   :  { %v910_v58 = vpop.permute.xlu1 %909  ;;  %v860_v59 = vpop.permute.xlu0 %859 }
 0x1c1   :  { %v920_v62 = vmul.f32 %v910_v58, %v848_v53  ;;  %v936_v0 = vpack.c.bf16 %v926_v56, %v925_v54  ;;  %v875_v24 = vmul.f32 %v860_v59, %v843_v23 }
 0x1c3   :  { %v928_v7 = vadd.f32 %v920_v62, %v896_v61  ;;  %1680 = vmatprep.subr.bf16.mxu0 %v936_v0  ;;  %v883_v36 = vadd.f32 %v875_v24, %v851_v30  ;;  %v1013_v30 = vld [vmem:[%s2406_s5 + $0x8] sm:$0xff] }
 0x1c4   :  { %v914_v63 = vpop.permute.xlu1 %913  ;;  %1681 = vmatpush3.bf16.xpose.msra.mxu0 %v936_v0  ;;  %v864_v8 = vpop.permute.xlu0 %863 }
 0x1c5   :  { %v922_v12 = vmul.f32 %v914_v63, %v850_v3  ;;  %v937_v13 = vpack.c.bf16 %v928_v7, %v927_v4  ;;  %v877_v37 = vmul.f32 %v864_v8, %v845_v35 }
 0x1c7   :  { %v930_v28 = vadd.f32 %v922_v12, %v898_v11  ;;  %1682 = vmatprep.subr.bf16.mxu0 %v937_v13  ;;  %v885_v46 = vadd.f32 %v877_v37, %v853_v16 }
 0x1c8   :  { %v862_v29 = vpop.permute.xlu1 %861  ;;  %v868_v34 = vpop.permute.xlu0 %867 }
 0x1c9   :  { %v876_v32 = vmul.f32 %v862_v29, %v844_v27  ;;  %v938_v33 = vpack.c.bf16 %v930_v28, %v929_v14  ;;  %v879_v48 = vmul.f32 %v868_v34, %v847_v43  ;;  %v856_v27 = vmul.f32 %v840_v52, %v2175_v21 }
 0x1ca   :  { %v188_v21 = vsub.s32 5, %v2119_v45 }
 0x1cb   :  { %v884_v38 = vadd.f32 %v876_v32, %v852_v31  ;;  %v887_v50 = vadd.f32 %v879_v48, %v855_v26  ;;  %v1014_v31 = vld [vmem:[%s2406_s5 + $0x10] sm:$0xff] }
 0x1cc   :  { %1683 = vmatpush3.bf16.xpose.msra.mxu0 %v937_v13  ;;  %v866_v5 = vpop.permute.xlu1 %865  ;;  %v872_v18 = vpop.permute.xlu0 %871  ;;  %v189_v52 = vrot.slane %v2125_v47, %v188_v21  ;;  %v1012_v13 = vld [vmem:[%s2406_s5] sm:$0xff] }
 0x1cd   :  { %v878_v23 = vmul.f32 %v866_v5, %v846_v41  ;;  %1684 = vmatprep.subr.bf16.mxu0 %v938_v33  ;;  %v931_v44 = vpack.c.bf16 %v884_v38, %v883_v36  ;;  %v881_v54 = vmul.f32 %v872_v18, %v849_v57  ;;  %v1015_v5 = vld [vmem:[%s2406_s5 + $0x18] sm:$0xff] }
 0x1cf   :  { %v886_v9 = vadd.f32 %v878_v23, %v854_v42  ;;  %1686 = vmatprep.mubr.bf16.mxu0 %v931_v44  ;;  %v889_v55 = vadd.f32 %v881_v54, %v857_v39 }
 0x1d0   :  { %v870_v25 = vpop.permute.xlu1 %869 }
 0x1d1   :  { %v932_v35 = vpack.c.bf16 %v886_v9, %v885_v46  ;;  %v880_v49 = vmul.f32 %v870_v25, %v848_v53  ;;  %v816_v53 = vpop.f32.mrb[8].mxu0  ;;  %v1016_v46 = vld [vmem:[%s2406_s5 + $0x20] sm:$0xff] }
 0x1d2   :  { %v817_v19 = vadd.f32 %v816_v53, %v185_v51  ;;  %v818_v57 = vpop.f32.mrb[9].mxu0 }
 0x1d3   :  { %v888_v15 = vadd.f32 %v880_v49, %v856_v27  ;;  %v819_v22 = vadd.f32 %v818_v57, %v189_v52  ;;  %v820_v59 = vpop.f32.mrb[10].mxu0  ;;  %v1017_v27 = vld [vmem:[%s2406_s5 + $0x28] sm:$0xff] }
 0x1d4   :  { %1685 = vmatpush3.bf16.xpose.msra.mxu0 %v938_v33  ;;  %v874_v20 = vpop.permute.xlu1 %873  ;;  %v821_v60 = vadd.f32 %v820_v59, %v185_v51  ;;  %v822_v61 = vpop.f32.mrb[11].mxu0 }
 0x1d5   :  { %v882_v41 = vmul.f32 %v874_v20, %v850_v3  ;;  %v933_v43 = vpack.c.bf16 %v888_v15, %v887_v50  ;;  %v823_v62 = vadd.f32 %v822_v61, %v189_v52  ;;  %v826_v2 = vpop.f32.mrb[12].mxu0 }
 0x1d6   :  { %v1121_v0 = vpack.c.bf16 %v821_v60, %v817_v19  ;;  %v827_v3 = vadd.f32 %v826_v2, %v185_v51  ;;  %v828_v4 = vpop.f32.mrb[13].mxu0 }
 0x1d7   :  { %v890_v56 = vadd.f32 %v882_v41, %v858_v40  ;;  %v1123_v1 = vpack.c.bf16 %v823_v62, %v819_v22  ;;  %v829_v45 = vadd.f32 %v828_v4, %v189_v52  ;;  %v830_v6 = vpop.f32.mrb[14].mxu0  ;;  %v1019_v41 = vld [vmem:[%s2406_s5 + $0x38] sm:$0xff] }
 0x1d8   :  { %1694 = vmatprep.subr.bf16.mxu1 %v1121_v0  ;;  %v831_v7 = vadd.f32 %v830_v6, %v185_v51  ;;  %v832_v63 = vpop.f32.mrb[15].mxu0 }
 0x1d9   :  { %v934_v58 = vpack.c.bf16 %v890_v56, %v889_v55  ;;  %1695 = vmatpush3.bf16.msra.mxu1 %v1121_v0  ;;  %v833_v47 = vadd.f32 %v832_v63, %v189_v52 }
 0x1da   :  { %v1122_v8 = vpack.c.bf16 %v831_v7, %v827_v3 }
 0x1db   :  { %1687 = vmatmul.mubr.bf16.vlgmr.msra.gmra.mrb[16].mxu0 %v932_v35  ;;  %v1124_v10 = vpack.c.bf16 %v833_v47, %v829_v45  ;;  %v1018_v35 = vld [vmem:[%s2406_s5 + $0x30] sm:$0xff] }
 0x1dc   :  { %1690 = vmatprep.mubr.bf16.mxu0 %v933_v43  ;;  %1696 = vmatprep.subr.bf16.mxu1 %v1122_v8 }
 0x1dd   :  { %1697 = vmatpush3.bf16.msra.mxu1 %v1122_v8 }
 0x1de   :  { %1698 = vmatprep.subr.bf16.mxu1 %v1123_v1 }
 0x1e1   :  { %1699 = vmatpush3.bf16.msra.mxu1 %v1123_v1 }
 0x1e2   :  { %1700 = vmatprep.subr.bf16.mxu1 %v1124_v10 }
 0x1e3   :  { %1691 = vmatmul.mubr.bf16.gmra.mrb[20].mxu0 %v934_v58 }
 0x1e5   :  { %1701 = vmatpush3.bf16.msra.mxu1 %v1124_v10 }
 0x2ae   :  { %v1688_v11 = vpop.f32.mrb[16].mxu0 }
 0x2af   :  { %v973_v12 = vpop.f32.mrb[17].mxu0  ;;  %v1006_v14 = vmul.f32 0.088388346, %v1688_v11 }
 0x2b0   :  { %v1004_v24 = vmul.f32 0.088388346, %v973_v12  ;;  %v1689_v28 = vpop.f32.mrb[18].mxu0 }
 0x2b1   :  { %v976_v29 = vpop.f32.mrb[19].mxu0  ;;  %v1007_v34 = vmul.f32 0.088388346, %v1689_v28  ;;  %v1022_v38 = vadd.f32 %v1014_v31, %v1006_v14 }
 0x2b2   :  { %v1005_v32 = vmul.f32 0.088388346, %v976_v29  ;;  %v1020_v33 = vadd.f32 %v1012_v13, %v1004_v24 }
 0x2b3   :  { %v1023_v44 = vadd.f32 %v1015_v5, %v1007_v34  ;;  %v1035_v25 = vsel %vm1028_vm0, %v1022_v38, -inf }
 0x2b4   :  { %v1029_v36 = vsel %vm1028_vm0, %v1020_v33, -inf  ;;  %v1021_v37 = vadd.f32 %v1013_v30, %v1005_v32 }
 0x2b5   :  { %1030 = vmax.xlane.f32.xlu0 %v1029_v36  ;;  %v1038_v54 = vsel %vm1028_vm0, %v1023_v44, -inf }
 0x2b6   :  { %v1692_v16 = vpop.f32.mrb[20].mxu0  ;;  %v1032_v42 = vsel %vm1028_vm0, %v1021_v37, -inf }
 0x2b7   :  { %1033 = vmax.xlane.f32.xlu1 %v1032_v42  ;;  %v989_v23 = vpop.f32.mrb[21].mxu0  ;;  %v1010_v48 = vmul.f32 0.088388346, %v1692_v16  ;;  %v1873_v16 = vld [vmem:[%s2407_s6 + $0x84] ss:$8 sps:$4 sm:$0xff]  }
 0x2b8   :  { %v1008_v9 = vmul.f32 0.088388346, %v989_v23  ;;  %v1693_v18 = vpop.f32.mrb[22].mxu0  ;;  %1318 = vmatprep.subr.bf16.mxu1 %v1873_v16  ;;  %v1904_v16 = vld [vmem:[%s2407_s6 + $0x30] ss:$8 sps:$4 sm:$0xff]  }
 0x2b9   :  { %1036 = vmax.xlane.f32.xlu0 %v1035_v25  ;;  %v992_v26 = vpop.f32.mrb[23].mxu0  ;;  %v1011_v15 = vmul.f32 0.088388346, %v1693_v18  ;;  %v1026_v40 = vadd.f32 %v1018_v35, %v1010_v48 }
 0x2ba   :  { %v1009_v49 = vmul.f32 0.088388346, %v992_v26  ;;  %v1024_v50 = vadd.f32 %v1016_v46, %v1008_v9 }
 0x2bb   :  { %v1047_v43 = vsel %vm1028_vm0, %v1026_v40, -inf  ;;  %v1027_v56 = vadd.f32 %v1019_v41, %v1011_v15 }
 0x2bc   :  { %v1025_v20 = vadd.f32 %v1017_v27, %v1009_v49  ;;  %v1041_v39 = vsel %vm1028_vm0, %v1024_v50, -inf }
 0x2bd   :  { %1039 = vmax.xlane.f32.xlu0 %v1038_v54  ;;  %1042 = vmax.xlane.f32.xlu1 %v1041_v39  ;;  %v1050_v58 = vsel %vm1028_vm0, %v1027_v56, -inf }
 0x2be   :  { %v1044_v55 = vsel %vm1028_vm0, %v1025_v20, -inf }
 0x2c1   :  { %1048 = vmax.xlane.f32.xlu1 %v1047_v43  ;;  %1045 = vmax.xlane.f32.xlu0 %v1044_v55  ;;  %v1876_v43 = vld [vmem:[%s2407_s6 + $0x94] ss:$8 sps:$4 sm:$0xff]  }
 0x2c5   :  { %1051 = vmax.xlane.f32.xlu0 %v1050_v58  ;;  %v1874_v58 = vld [vmem:[%s2407_s6 + $0x90] ss:$8 sps:$4 sm:$0xff]  }
 0x342   :  { %v1031_v17 = vpop.xlane.xlu0 %1030 }
 0x343   :  { %v1053_v21 = vsub.f32 %v1020_v33, %v1031_v17 }
 0x344   :  { %v1034_v51 = vpop.xlane.xlu1 %1033 }
 0x345   :  { %v1061_v52 = vmul.f32 1.442695, %v1053_v21  ;;  %v1054_v53 = vsub.f32 %v1021_v37, %v1034_v51 }
 0x346   :  { %v1037_v19 = vpop.xlane.xlu0 %1036 }
 0x347   :  { %1919 = vpow2.f32 %v1061_v52  ;;  %v1063_v57 = vmul.f32 1.442695, %v1054_v53  ;;  %v1055_v22 = vsub.f32 %v1022_v38, %v1037_v19  ;;  %v1879_v52 = vld [vmem:[%s2407_s6 + $0xa4] ss:$8 sps:$4 sm:$0xff]  }
 0x349   :  { %1921 = vpow2.f32 %v1063_v57  ;;  %v1065_v59 = vmul.f32 1.442695, %v1055_v22 }
 0x34a   :  { %v1040_v60 = vpop.xlane.xlu0 %1039  ;;  %v1043_v61 = vpop.xlane.xlu1 %1042 }
 0x34b   :  { %1923 = vpow2.f32 %v1065_v59  ;;  %v1056_v62 = vsub.f32 %v1023_v44, %v1040_v60  ;;  %v1057_v0 = vsub.f32 %v1024_v50, %v1043_v61  ;;  %v1877_v59 = vld [vmem:[%s2407_s6 + $0xa0] ss:$8 sps:$4 sm:$0xff]   ;;  %v1882_v61 = vld [vmem:[%s2407_s6 + $0xb4] ss:$8 sps:$4 sm:$0xff]  }
 0x34d   :  { %v1067_v1 = vmul.f32 1.442695, %v1056_v62  ;;  %v1069_v2 = vmul.f32 1.442695, %v1057_v0  ;;  %v1880_v62 = vld [vmem:[%s2407_s6 + $0xb0] ss:$8 sps:$4 sm:$0xff]  }
 0x34e   :  { %v1049_v3 = vpop.xlane.xlu1 %1048  ;;  %v1046_v4 = vpop.xlane.xlu0 %1045  ;;  %v1885_v0 = vld [vmem:[%s2407_s6 + $0xc4] ss:$8 sps:$4 sm:$0xff]  }
 0x34f   :  { %1925 = vpow2.f32 %v1067_v1  ;;  %v1059_v45 = vsub.f32 %v1026_v40, %v1049_v3  ;;  %v1058_v6 = vsub.f32 %v1025_v20, %v1046_v4  ;;  %v1871_v40 = vld [vmem:[%s2407_s6 + $0x80] ss:$8 sps:$4 sm:$0xff]   ;;  %v1888_v3 = vld [vmem:[%s2407_s6 + $0xd4] ss:$8 sps:$4 sm:$0xff]  }
 0x350   :  { %1927 = vpow2.f32 %v1069_v2  ;;  %v1883_v1 = vld [vmem:[%s2407_s6 + $0xc0] ss:$8 sps:$4 sm:$0xff]   ;;  %v1886_v2 = vld [vmem:[%s2407_s6 + $0xd0] ss:$8 sps:$4 sm:$0xff]  }
 0x351   :  { %v1920_v7 = vpop.eup %1919  ;;  %v1073_v63 = vmul.f32 1.442695, %v1059_v45  ;;  %v1071_v47 = vmul.f32 1.442695, %v1058_v6  ;;  %v1889_v4 = vld [vmem:[%s2407_s6 + $0xe0] ss:$8 sps:$4 sm:$0xff]  }
 0x352   :  { %v1052_v8 = vpop.xlane.xlu0 %1051  ;;  %v1077_v10 = vsel %vm1028_vm0, %v1920_v7, 0.0  ;;  %v1891_v45 = vld [vmem:[%s2407_s6 + $0xe4] ss:$8 sps:$4 sm:$0xff]   ;;  %v1894_v6 = vld [vmem:[%s2407_s6 + $0xf4] ss:$8 sps:$4 sm:$0xff]  }
 0x353   :  { %v1922_v11 = vpop.eup %1921  ;;  %1929 = vpow2.f32 %v1073_v63  ;;  %v1060_v12 = vsub.f32 %v1027_v56, %v1052_v8  ;;  %1078 = vadd.xlane.f32.xlu1 %v1077_v10  ;;  %v1897_v63 = vld [vmem:[%s2407_s6 + $0x4] ss:$8 sps:$4 sm:$0xff]  }
 0x354   :  { %1931 = vpow2.f32 %v1071_v47  ;;  %v1080_v13 = vsel %vm1028_vm0, %v1922_v11, 0.0  ;;  %v2030_v47 = vmov 0  }
 0x355   :  { %v1924_v14 = vpop.eup %1923  ;;  %v1075_v24 = vmul.f32 1.442695, %v1060_v12  ;;  %1081 = vadd.xlane.f32.xlu0 %v1080_v13 }
 0x356   :  { %v1083_v28 = vsel %vm1028_vm0, %v1924_v14, 0.0 }
 0x357   :  { %1933 = vpow2.f32 %v1075_v24  ;;  %1084 = vadd.xlane.f32.xlu1 %v1083_v28 }
 0x359   :  { %v1926_v29 = vpop.eup %1925 }
 0x35a   :  { %v1928_v30 = vpop.eup %1927  ;;  %v1086_v31 = vsel %vm1028_vm0, %v1926_v29, 0.0 }
 0x35b   :  { %v1089_v32 = vsel %vm1028_vm0, %v1928_v30, 0.0  ;;  %1087 = vadd.xlane.f32.xlu0 %v1086_v31 }
 0x35c   :  { %1090 = vadd.xlane.f32.xlu1 %v1089_v32  ;;  %v1895_v32 = vld [vmem:[%s2407_s6] ss:$8 sps:$4 sm:$0xff]  }
 0x35d   :  { %v1930_v33 = vpop.eup %1929 }
 0x35e   :  { %v1932_v34 = vpop.eup %1931  ;;  %v1095_v36 = vsel %vm1028_vm0, %v1930_v33, 0.0 }
 0x35f   :  { %v1092_v37 = vsel %vm1028_vm0, %v1932_v34, 0.0 }
 0x360   :  { %1096 = vadd.xlane.f32.xlu1 %v1095_v36  ;;  %1093 = vadd.xlane.f32.xlu0 %v1092_v37  ;;  %v1898_v36 = vld [vmem:[%s2407_s6 + $0x10] ss:$8 sps:$4 sm:$0xff]   ;;  %v1903_v37 = vld [vmem:[%s2407_s6 + $0x24] ss:$8 sps:$4 sm:$0xff]  }
 0x361   :  { %v1934_v38 = vpop.eup %1933 }
 0x362   :  { %v1098_v5 = vsel %vm1028_vm0, %v1934_v38, 0.0 }
 0x364   :  { %1099 = vadd.xlane.f32.xlu0 %v1098_v5  ;;  %v1906_v5 = vld [vmem:[%s2407_s6 + $0x34] ss:$8 sps:$4 sm:$0xff]  }
 0x3e0   :  { %v1079_v42 = vpop.xlane.xlu1 %1078 }
 0x3e1   :  { %1935 = vrcp.f32 %v1079_v42  ;;  %v1909_v42 = vld [vmem:[%s2407_s6 + $0x44] ss:$8 sps:$4 sm:$0xff]  }
 0x3e2   :  { %v1082_v23 = vpop.xlane.xlu0 %1081 }
 0x3e3   :  { %1937 = vrcp.f32 %v1082_v23  ;;  %v1907_v23 = vld [vmem:[%s2407_s6 + $0x40] ss:$8 sps:$4 sm:$0xff]  }
 0x3e4   :  { %v1085_v44 = vpop.xlane.xlu1 %1084 }
 0x3e5   :  { %1939 = vrcp.f32 %v1085_v44  ;;  %v1912_v44 = vld [vmem:[%s2407_s6 + $0x54] ss:$8 sps:$4 sm:$0xff]  }
 0x3e8   :  { %v1088_v46 = vpop.xlane.xlu0 %1087 }
 0x3e9   :  { %v1091_v48 = vpop.xlane.xlu1 %1090  ;;  %1941 = vrcp.f32 %v1088_v46  ;;  %v1910_v46 = vld [vmem:[%s2407_s6 + $0x50] ss:$8 sps:$4 sm:$0xff]  }
 0x3ea   :  { %1943 = vrcp.f32 %v1091_v48  ;;  %v1915_v48 = vld [vmem:[%s2407_s6 + $0x64] ss:$8 sps:$4 sm:$0xff]  }
 0x3eb   :  { %v1936_v9 = vpop.eup %1935 }
 0x3ec   :  { %v1102_v27 = vmul.f32 %v1936_v9, %v1920_v7  ;;  %v1892_v7 = vld [vmem:[%s2407_s6 + $0xf0] ss:$8 sps:$4 sm:$0xff]   ;;  %v1913_v9 = vld [vmem:[%s2407_s6 + $0x60] ss:$8 sps:$4 sm:$0xff]  }
 0x3ed   :  { %v1938_v18 = vpop.eup %1937  ;;  %v1097_v25 = vpop.xlane.xlu1 %1096 }
 0x3ee   :  { %v1094_v26 = vpop.xlane.xlu0 %1093  ;;  %v1104_v35 = vmul.f32 %v1938_v18, %v1922_v11  ;;  %v1918_v18 = vld [vmem:[%s2407_s6 + $0x74] ss:$8 sps:$4 sm:$0xff]  }
 0x3ef   :  { %1945 = vrcp.f32 %v1094_v26  ;;  %v1940_v50 = vpop.eup %1939 }
 0x3f0   :  { %1947 = vrcp.f32 %v1097_v25  ;;  %v1117_v49 = vpack.c.bf16 %v1104_v35, %v1102_v27  ;;  %v1106_v20 = vmul.f32 %v1940_v50, %v1924_v14  ;;  %v1916_v25 = vld [vmem:[%s2407_s6 + $0x70] ss:$8 sps:$4 sm:$0xff]  }
 0x3f2   :  { %v1100_v54 = vpop.xlane.xlu0 %1099  ;;  %1702 = vmatprep.mubr.msk.bf16.mxu1 %vm1028_vm0, %v1117_v49 }
 0x3f3   :  { %1949 = vrcp.f32 %v1100_v54  ;;  %v1942_v15 = vpop.eup %1941 }
 0x3f4   :  { %v1108_v39 = vmul.f32 %v1942_v15, %v1926_v29  ;;  %v1944_v55 = vpop.eup %1943 }
 0x3f5   :  { %v1110_v21 = vmul.f32 %v1944_v55, %v1928_v30 }
 0x3f6   :  { %v1118_v41 = vpack.c.bf16 %v1108_v39, %v1106_v20 }
 0x3f8   :  { %1703 = vmatmul.mubr.msk.bf16.vlgmr.msra.gmra.mrb[8].mxu1 %vm1028_vm0, %v1118_v41 }
 0x3f9   :  { %v1946_v56 = vpop.eup %1945  ;;  %1319 = vmatpush1.bf16.msra.mxu1 %v1871_v40 }
 0x3fa   :  { %v1948_v17 = vpop.eup %1947  ;;  %v1112_v51 = vmul.f32 %v1946_v56, %v1932_v34  ;;  %1320 = vmatprep.subr.bf16.mxu1 %v1876_v43  ;;  %v1900_v34 = vld [vmem:[%s2407_s6 + $0x14] ss:$8 sps:$4 sm:$0xff]  }
 0x3fb   :  { %v1114_v57 = vmul.f32 %v1948_v17, %v1930_v33 }
 0x3fc   :  { %v1119_v19 = vpack.c.bf16 %v1112_v51, %v1110_v21 }
 0x3fd   :  { %v1950_v53 = vpop.eup %1949  ;;  %1321 = vmatpush1.bf16.msra.mxu1 %v1874_v58 }
 0x3fe   :  { %v1116_v22 = vmul.f32 %v1950_v53, %v1934_v38  ;;  %1706 = vmatprep.mubr.msk.bf16.mxu1 %vm1028_vm0, %v1119_v19  ;;  %1322 = vmatprep.subr.bf16.mxu1 %v1879_v52  ;;  %v1901_v38 = vld [vmem:[%s2407_s6 + $0x20] ss:$8 sps:$4 sm:$0xff]   ;;  %s1995_s6 = scalar_lea.vmem %s1518_s3, 1024 }
 0x3ff   :  { %p1996_p2 = scmp.ne.s32.totalorder %s1518_s3, %s1995_s6  ;;  %p2001_p4 = scmp.lt.s32.totalorder %s1995_s6, %s1995_s6 }
 0x400   :  { %v1120_v60 = vpack.c.bf16 %v1116_v22, %v1114_v57 }
 0x401   :  { %1323 = vmatpush1.bf16.msra.mxu1 %v1877_v59  ;;  %p2002_p5 = por %p2001_p4, %p2000_p3 }
 0x402   :  { %1707 = vmatmul.mubr.msk.bf16.gmra.mrb[12].mxu1 %vm1028_vm0, %v1120_v60  ;;  %1324 = vmatprep.subr.bf16.mxu1 %v1882_v61 }
 0x403   :  { %1350 = vmatprep.mubr.bf16.mxu1 %v2030_v47  ;;  %p2003_p6 = pnand %p2002_p5, %p1996_p2 }
 0x405   :  { %1325 = vmatpush1.bf16.msra.mxu1 %v1880_v62 }
 0x406   :  { %1326 = vmatprep.subr.bf16.mxu1 %v1885_v0 }
 0x409   :  { %1327 = vmatpush1.bf16.msra.mxu1 %v1883_v1 }
 0x40a   :  { %1328 = vmatprep.subr.bf16.mxu1 %v1888_v3 }
 0x40d   :  { %1329 = vmatpush1.bf16.msra.mxu1 %v1886_v2 }
 0x40e   :  { %1330 = vmatprep.subr.bf16.mxu1 %v1891_v45 }
 0x411   :  { %1331 = vmatpush1.bf16.msra.mxu1 %v1889_v4 }
 0x412   :  { %1332 = vmatprep.subr.bf16.mxu1 %v1894_v6 }
 0x415   :  { %1333 = vmatpush1.bf16.msra.mxu1 %v1892_v7 }
 0x416   :  { %1451 = vmatprep.subr.bf16.mxu1 %v1897_v63 }
 0x4cb   :  { %v1704_v8 = vpop.f32.mrb[8].mxu1 }
 0x4cc   :  { %v1171_v10 = vpop.f32.mrb[9].mxu1 }
 0x4cd   :  { %v1705_v11 = vpop.f32.mrb[10].mxu1 }
 0x4ce   :  { %v1203_v12 = vpack.c.bf16 %v1705_v11, %v1704_v8  ;;  %v1174_v13 = vpop.f32.mrb[11].mxu1 }
 0x4cf   :  { %v1202_v14 = vpack.c.bf16 %v1174_v13, %v1171_v10 }
 0x4d5   :  { %v1708_v24 = vpop.f32.mrb[12].mxu1 }
 0x4d6   :  { %v1187_v28 = vpop.f32.mrb[13].mxu1 }
 0x4d7   :  { %v1709_v29 = vpop.f32.mrb[14].mxu1 }
 0x4d8   :  { %v1221_v30 = vpack.c.bf16 %v1709_v29, %v1708_v24  ;;  %v1190_v31 = vpop.f32.mrb[15].mxu1 }
 0x4d9   :  { %v1220_v33 = vpack.c.bf16 %v1190_v31, %v1187_v28 }
 0x4db   :  { %1351 = vmatmul.mubr.bf16.vlgmr.msra.gmra.mrb[16].mxu1 %v1220_v33 }
 0x4dc   :  { %1452 = vmatpush1.bf16.msra.mxu1 %v1895_v32  ;;  %1360 = vmatprep.mubr.bf16.mxu1 %v2030_v47 }
 0x4dd   :  { %1453 = vmatprep.subr.bf16.mxu1 %v1900_v34 }
 0x4e0   :  { %1454 = vmatpush1.bf16.msra.mxu1 %v1898_v36 }
 0x4e1   :  { %1455 = vmatprep.subr.bf16.mxu1 %v1903_v37 }
 0x4e3   :  { %1361 = vmatmul.mubr.bf16.gmra.mrb[20].mxu1 %v1221_v30 }
 0x4e4   :  { %1456 = vmatpush1.bf16.msra.mxu1 %v1901_v38  ;;  %1483 = vmatprep.mubr.bf16.mxu1 %v2030_v47 }
 0x4e5   :  { %1457 = vmatprep.subr.bf16.mxu1 %v1906_v5 }
 0x4e8   :  { %1458 = vmatpush1.bf16.msra.mxu1 %v1904_v16 }
 0x4e9   :  { %1459 = vmatprep.subr.bf16.mxu1 %v1909_v42 }
 0x4ec   :  { %1460 = vmatpush1.bf16.msra.mxu1 %v1907_v23 }
 0x4ed   :  { %1461 = vmatprep.subr.bf16.mxu1 %v1912_v44 }
 0x4f0   :  { %1462 = vmatpush1.bf16.msra.mxu1 %v1910_v46 }
 0x4f1   :  { %1463 = vmatprep.subr.bf16.mxu1 %v1915_v48 }
 0x4f4   :  { %1464 = vmatpush1.bf16.msra.mxu1 %v1913_v9 }
 0x4f5   :  { %1465 = vmatprep.subr.bf16.mxu1 %v1918_v18 }
 0x4f8   :  { %1466 = vmatpush1.bf16.msra.mxu1 %v1916_v25 }
 0x4fb   :  { %1484 = vmatmul.mubr.bf16.vlgmr.msra.gmra.mrb[16].mxu1 %v1202_v14 }
 0x4fc   :  { %1493 = vmatprep.mubr.bf16.mxu1 %v2030_v47 }
 0x503   :  { %1494 = vmatmul.mubr.bf16.gmra.mrb[20].mxu1 %v1203_v12 }
 0x5ce   :  { %v1485_v26 = vpop.f32.mrb[16].mxu1 }
 0x5cf   :  { %1504 = vst [vmem:[#allocation7] sm:$0xff] %v1485_v26  ;;  %v1487_v27 = vpop.f32.mrb[17].mxu1 }
 0x5d0   :  { %1505 = vst [vmem:[#allocation7 + $0x8] sm:$0xff] %v1487_v27  ;;  %v1489_v35 = vpop.f32.mrb[18].mxu1 }
 0x5d1   :  { %1506 = vst [vmem:[#allocation7 + $0x10] sm:$0xff] %v1489_v35  ;;  %v1491_v49 = vpop.f32.mrb[19].mxu1 }
 0x5d2   :  { %1507 = vst [vmem:[#allocation7 + $0x18] sm:$0xff] %v1491_v49 }
 0x5d6   :  { %v1495_v50 = vpop.f32.mrb[20].mxu1 }
 0x5d7   :  { %1508 = vst [vmem:[#allocation7 + $0x20] sm:$0xff] %v1495_v50  ;;  %v1497_v54 = vpop.f32.mrb[21].mxu1 }
 0x5d8   :  { %1509 = vst [vmem:[#allocation7 + $0x28] sm:$0xff] %v1497_v54  ;;  %v1499_v15 = vpop.f32.mrb[22].mxu1 }
 0x5d9   :  { %1510 = vst [vmem:[#allocation7 + $0x30] sm:$0xff] %v1499_v15  ;;  %v1501_v20 = vpop.f32.mrb[23].mxu1 }
 0x5da   :  { %1511 = vst [vmem:[#allocation7 + $0x38] sm:$0xff] %v1501_v20 }
 0x5db   :  { %2006 = shalt.err (!%p2003_p6)
}
 0x5dc   :  { %s2007_s17 = scalar_lea.hbm %s2408_s7, 1024 }
 0x5dd   :  { %p2008_p7 = scmp.ne.s32.totalorder %s2408_s7, %s2007_s17  ;;  %p2011_p8 = scmp.lt.u32.totalorder %s2007_s17, %s2408_s7 }
 0x5df   :  { %p2013_p9 = pnand %p2011_p8, %p2008_p7 }
 0x5e1   :  { %2016 = shalt.err (!%p2013_p9)
}
 0x5e2   :  { %1523 = dma.vmem_to_hbm [thread:$0]  %s1518_s3, 1024, %s2408_s7, [#allocation4], %s2024_s11, %s2024_s11, %s2025_s12  }
 0x5e3   :  { %2021 = dma.done.wait [#allocation4], 1024  }
 0x5e4   :  { %2022 = vsyncadd [#allocation4], 4294966272 }
 0x5e5   :  { %1527 = vsyncpa [#allocation3], 1 }
 0x5e6   :  { %1528 = vsyncpa [#allocation6], 1 }
 0x5e7   :  { %1529 = vsyncpa [#allocation4], 1 }

</bundles_post_ra>
